<compile_context>
chip_gen: v7x
topology: tpu7x:2x2x1
jax: 0.10.0
libtpu: 0.0.40
codegen_flags: <defaults>
</compile_context>

<pallas_src>
import jax
import jax.numpy as jnp
from jax.experimental import pallas as pl
from jax.experimental.pallas import tpu as pltpu

EPS = 1e-5
F32 = jnp.float32
BF16 = jnp.bfloat16


def _silu(x):
    return x * jax.nn.sigmoid(x)


def _layernorm(h, gamma, beta, n_real):
    """LayerNorm over the last dim; if the array is zero-padded beyond n_real
    features, mean/var are computed over the real features only (padded gamma/beta
    are zero, so padded columns come out as exactly 0)."""
    n_total = h.shape[-1]
    if n_real == n_total:
        mu = jnp.mean(h, axis=-1, keepdims=True)
        d = h - mu
        var = jnp.mean(d * d, axis=-1, keepdims=True)
    else:
        inv_n = 1.0 / n_real
        mu = jnp.sum(h, axis=-1, keepdims=True) * inv_n
        lane = jax.lax.broadcasted_iota(jnp.int32, (1, n_total), 1)
        d = jnp.where(lane < n_real, h - mu, 0.0)
        var = jnp.sum(d * d, axis=-1, keepdims=True) * inv_n
    return (h - mu) * jax.lax.rsqrt(var + EPS) * gamma + beta


def _round_up(x, m):
    return (x + m - 1) // m * m


def _pad2(a, rows, cols):
    return jnp.pad(a, ((0, rows - a.shape[0]), (0, cols - a.shape[1])))


def resnet_block(x, temb, params, *, block_b=256):
    """x: [B, Cin], temb: [B, Ct] -> [B, Cout].  Eval-mode forward (dropout = id)."""
    B, Cin = x.shape
    _, Ct = temb.shape
    Cout = params["w1"].shape[1]
    needs_adjust = (Cin != Cout)

    # Lane-dense padded feature widths.
    Cin_p = _round_up(Cin, 128)
    Ct_p = _round_up(Ct, 128)
    Cout_p = _round_up(Cout, 128)

    # Batch tiling (rows padded to a multiple of 8 sublanes, then of TB).
    TB = min(block_b, _round_up(B, 8))
    B_p = _round_up(B, TB)
    G = B_p // TB

    # ---- wrapper-side parameter packing (all padding with zeros) -------------
    xp = _pad2(x.astype(F32), B_p, Cin_p)
    tp = _pad2(temb.astype(F32), B_p, Ct_p)

    # norm1 gamma/beta stacked -> [2, Cin_p]
    n1 = _pad2(jnp.concatenate([params["g1"], params["bn1"]], axis=0), 2, Cin_p)

    # fused fc1 | temb_proj weight -> [Cin_p + Ct_p, Cout_p] (bf16 in HBM)
    w1t = jnp.concatenate(
        [_pad2(params["w1"], Cin_p, Cout_p), _pad2(params["wt"], Ct_p, Cout_p)],
        axis=0).astype(BF16)
    w2 = _pad2(params["w2"], Cout_p, Cout_p).astype(BF16)

    # Cout-wide vectors stacked: row 0 = fused bias (b1+bt), 1 = gamma2, 2 = beta2,
    # 3 = b2, (4 = ba if adjust).
    vec_rows = [params["b1"] + params["bt"], params["g2"], params["bn2"], params["b2"]]
    args_extra = []
    specs_extra = []
    if needs_adjust:
        vec_rows.append(params["ba"])
        wa = _pad2(params["wa"], Cin_p, Cout_p).astype(BF16)
        args_extra.append(wa)
        specs_extra.append(pl.BlockSpec((Cin_p, Cout_p), lambda i: (0, 0)))
    vecs = _pad2(jnp.concatenate(vec_rows, axis=0), len(vec_rows), Cout_p)
    n_vec = vecs.shape[0]

    # ---- kernel ---------------------------------------------------------------
    def kernel(x_ref, t_ref, n1_ref, w1t_ref, vec_ref, w2_ref, *rest):
        if needs_adjust:
            wa_ref, o_ref = rest
        else:
            (o_ref,) = rest

        xv = x_ref[...]                                     # f32 [TB, Cin_p]

        # h = silu(norm1(x)); t = silu(temb); fused fc1 + temb_proj matmul.
        a = _silu(_layernorm(xv, n1_ref[0:1, :], n1_ref[1:2, :], Cin))
        t = _silu(t_ref[...])
        at = jnp.concatenate([a.astype(BF16), t.astype(BF16)], axis=-1)
        h = jnp.dot(at, w1t_ref[...], preferred_element_type=F32) + vec_ref[0:1, :]

        # norm2 (masked over real Cout) + silu.
        h = _silu(_layernorm(h, vec_ref[1:2, :], vec_ref[2:3, :], Cout))

        # TODO(synk): training-mode dropout (pltpu.prng_* + mask) not implemented;
        # eval-mode dropout is the identity.

        # fc2
        h = jnp.dot(h.astype(BF16), w2_ref[...], preferred_element_type=F32)
        h = h + vec_ref[3:4, :]

        # shortcut
        if needs_adjust:
            xs = jnp.dot(xv.astype(BF16), wa_ref[...],
                         preferred_element_type=F32) + vec_ref[4:5, :]
        else:
            xs = xv  # Cin_p == Cout_p here; padded columns are zero.

        o_ref[...] = (xs + h).astype(o_ref.dtype)

    in_specs = [
        pl.BlockSpec((TB, Cin_p), lambda i: (i, 0)),             # x    (batch-tiled)
        pl.BlockSpec((TB, Ct_p), lambda i: (i, 0)),              # temb (batch-tiled)
        pl.BlockSpec((2, Cin_p), lambda i: (0, 0)),              # norm1 gamma/beta
        pl.BlockSpec((Cin_p + Ct_p, Cout_p), lambda i: (0, 0)),  # fused w1|wt
        pl.BlockSpec((n_vec, Cout_p), lambda i: (0, 0)),         # stacked vectors
        pl.BlockSpec((Cout_p, Cout_p), lambda i: (0, 0)),        # w2
    ] + specs_extra

    out = pl.pallas_call(
        kernel,
        out_shape=jax.ShapeDtypeStruct((B_p, Cout_p), x.dtype),
        grid_spec=pltpu.PrefetchScalarGridSpec(
            num_scalar_prefetch=0,
            grid=(G,),
            in_specs=in_specs,
            out_specs=pl.BlockSpec((TB, Cout_p), lambda i: (i, 0)),
        ),
        compiler_params=pltpu.CompilerParams(
            dimension_semantics=("parallel",)),
    )(xp, tp, n1, w1t, vecs, w2, *args_extra)

    return out[:B, :Cout]


def init_params(key, in_features, out_features, temb_features):
    """Deterministic synthetic parameters (PyTorch-shaped, pre-transposed to [in,out])."""
    ks = jax.random.split(key, 4)

    def lin(k, fan_in, fan_out):
        bound = 1.0 / jnp.sqrt(fan_in)
        kw, kb = jax.random.split(k)
        w = jax.random.uniform(kw, (fan_in, fan_out), F32, -bound, bound)
        b = jax.random.uniform(kb, (1, fan_out), F32, -bound, bound)
        return w, b

    w1, b1 = lin(ks[0], in_features, out_features)
    wt, bt = lin(ks[1], temb_features, out_features)
    w2, b2 = lin(ks[2], out_features, out_features)
    wa, ba = lin(ks[3], in_features, out_features)  # only used if in != out

    return dict(
        g1=jnp.ones((1, in_features), F32), bn1=jnp.zeros((1, in_features), F32),
        w1=w1, b1=b1, wt=wt, bt=bt,
        g2=jnp.ones((1, out_features), F32), bn2=jnp.zeros((1, out_features), F32),
        w2=w2, b2=b2, wa=wa, ba=ba,
    )


def resnet_block_ref(x, temb, params):
    """Pure-JAX f32 reference mirroring the PyTorch forward (eval mode)."""
    h = _layernorm(x, params["g1"], params["bn1"], x.shape[-1])
    h = _silu(h)
    h = h @ params["w1"] + params["b1"]
    h = h + _silu(temb) @ params["wt"] + params["bt"]
    h = _layernorm(h, params["g2"], params["bn2"], h.shape[-1])
    h = _silu(h)
    h = h @ params["w2"] + params["b2"]
    xs = x
    if x.shape[-1] != params["w1"].shape[1]:
        xs = x @ params["wa"] + params["ba"]
    return xs + h


if __name__ == "__main__":
    test_cases = [
        # (B,  Cin, Cout, Ct)
        (32,   24,   48, 16),   # adjust_fc path; all feature dims padded to 128
        (16,   32,   32,  8),   # identity shortcut path
    ]
    key = jax.random.PRNGKey(0)
    for (B, Cin, Cout, Ct) in test_cases:
        key, kx, kt, kp = jax.random.split(key, 4)
        x = jax.random.normal(kx, (B, Cin), F32)
        temb = jax.random.normal(kt, (B, Ct), F32)
        params = init_params(kp, Cin, Cout, Ct)

        out = jax.block_until_ready(resnet_block(x, temb, params))
        ref = resnet_block_ref(x, temb, params)

        assert out.shape == (B, Cout)
        # bf16 matmul operands with f32 accumulate -> loosened tolerance vs f32 ref.
        assert jnp.allclose(out, ref, atol=5e-2, rtol=5e-2), (
            f"mismatch vs reference, max abs err = {jnp.max(jnp.abs(out - ref))}")

    print("KERNEL_OK")
</pallas_src>

<mosaic_0001>
module attributes {stable_mosaic.version = 11 : i64} {
  func.func @kernel(%arg0: i32, %arg1: memref<32x128xf32, #tpu.memory_space<vmem>>, %arg2: memref<32x128xf32, #tpu.memory_space<vmem>>, %arg3: memref<2x128xf32, #tpu.memory_space<vmem>>, %arg4: memref<256x128xbf16, #tpu.memory_space<vmem>>, %arg5: memref<5x128xf32, #tpu.memory_space<vmem>>, %arg6: memref<128x128xbf16, #tpu.memory_space<vmem>>, %arg7: memref<128x128xbf16, #tpu.memory_space<vmem>>, %arg8: memref<32x128xf32, #tpu.memory_space<vmem>>) attributes {dimension_semantics = [#tpu.dimension_semantics<parallel>], iteration_bounds = array<i64: 1>, scalar_prefetch = 0 : i64, scratch_operands = 0 : i64, tpu.core_type = #tpu.core_type<tc>, window_params = [{transform_indices = @transform_0, window_bounds = array<i64: 32, 128>}, {transform_indices = @transform_1, window_bounds = array<i64: 32, 128>}, {pipeline_mode = #tpu.pipeline_mode<synchronous>, transform_indices = @transform_2, window_bounds = array<i64: 2, 128>}, {pipeline_mode = #tpu.pipeline_mode<synchronous>, transform_indices = @transform_3, window_bounds = array<i64: 256, 128>}, {pipeline_mode = #tpu.pipeline_mode<synchronous>, transform_indices = @transform_4, window_bounds = array<i64: 5, 128>}, {pipeline_mode = #tpu.pipeline_mode<synchronous>, transform_indices = @transform_5, window_bounds = array<i64: 128, 128>}, {pipeline_mode = #tpu.pipeline_mode<synchronous>, transform_indices = @transform_6, window_bounds = array<i64: 128, 128>}, {transform_indices = @transform_7, window_bounds = array<i64: 32, 128>}]} {
    %c0 = arith.constant 0 : index
    %c0_0 = arith.constant 0 : index
    %0 = vector.load %arg1[%c0, %c0_0] : memref<32x128xf32, #tpu.memory_space<vmem>>, vector<32x128xf32>
    %c0_1 = arith.constant 0 : index
    %c0_2 = arith.constant 0 : index
    %1 = vector.load %arg3[%c0_1, %c0_2] : memref<2x128xf32, #tpu.memory_space<vmem>>, vector<1x128xf32>
    %c1 = arith.constant 1 : index
    %c0_3 = arith.constant 0 : index
    %2 = vector.load %arg3[%c1, %c0_3] : memref<2x128xf32, #tpu.memory_space<vmem>>, vector<1x128xf32>
    %cst = arith.constant dense<0.000000e+00> : vector<32xf32>
    %3 = vector.multi_reduction <add>, %0, %cst [1] : vector<32x128xf32> to vector<32xf32>
    %4 = vector.shape_cast %3 : vector<32xf32> to vector<32x1xf32>
    %cst_4 = arith.constant 0.0416666679 : f32
    %5 = vector.broadcast %cst_4 : f32 to vector<32x1xf32>
    %6 = arith.mulf %4, %5 : vector<32x1xf32>
    %7 = tpu.iota {dimensions = array<i32: 1>} : vector<1x128xi32>
    %c24_i32 = arith.constant 24 : i32
    %8 = vector.broadcast %c24_i32 : i32 to vector<1x128xi32>
    %9 = arith.cmpi slt, %7, %8 : vector<1x128xi32>
    %10 = vector.broadcast %6 : vector<32x1xf32> to vector<32x128xf32>
    %11 = arith.subf %0, %10 : vector<32x128xf32>
    %cst_5 = arith.constant 0.000000e+00 : f32
    %12 = vector.shape_cast %9 : vector<1x128xi1> to vector<1x128xi1>
    %13 = vector.broadcast %12 : vector<1x128xi1> to vector<32x128xi1>
    %14 = vector.broadcast %cst_5 : f32 to vector<32x128xf32>
    %15 = arith.select %13, %11, %14 : vector<32x128xi1>, vector<32x128xf32>
    %16 = arith.mulf %15, %15 : vector<32x128xf32>
    %cst_6 = arith.constant dense<0.000000e+00> : vector<32xf32>
    %17 = vector.multi_reduction <add>, %16, %cst_6 [1] : vector<32x128xf32> to vector<32xf32>
    %18 = vector.shape_cast %17 : vector<32xf32> to vector<32x1xf32>
    %cst_7 = arith.constant 0.0416666679 : f32
    %19 = vector.broadcast %cst_7 : f32 to vector<32x1xf32>
    %20 = arith.mulf %18, %19 : vector<32x1xf32>
    %21 = vector.broadcast %6 : vector<32x1xf32> to vector<32x128xf32>
    %22 = arith.subf %0, %21 : vector<32x128xf32>
    %cst_8 = arith.constant 9.99999974E-6 : f32
    %23 = vector.broadcast %cst_8 : f32 to vector<32x1xf32>
    %24 = arith.addf %20, %23 : vector<32x1xf32>
    %25 = math.rsqrt %24 : vector<32x1xf32>
    %26 = vector.broadcast %25 : vector<32x1xf32> to vector<32x128xf32>
    %27 = arith.mulf %22, %26 : vector<32x128xf32>
    %28 = vector.broadcast %1 : vector<1x128xf32> to vector<32x128xf32>
    %29 = arith.mulf %27, %28 : vector<32x128xf32>
    %30 = vector.broadcast %2 : vector<1x128xf32> to vector<32x128xf32>
    %31 = arith.addf %29, %30 : vector<32x128xf32>
    %32 = arith.negf %31 : vector<32x128xf32>
    %33 = math.exp %32 : vector<32x128xf32>
    %cst_9 = arith.constant 1.000000e+00 : f32
    %34 = vector.broadcast %cst_9 : f32 to vector<32x128xf32>
    %35 = arith.addf %34, %33 : vector<32x128xf32>
    %36 = arith.divf %34, %35 : vector<32x128xf32>
    %37 = arith.mulf %31, %36 : vector<32x128xf32>
    %c0_10 = arith.constant 0 : index
    %c0_11 = arith.constant 0 : index
    %38 = vector.load %arg2[%c0_10, %c0_11] : memref<32x128xf32, #tpu.memory_space<vmem>>, vector<32x128xf32>
    %39 = arith.negf %38 : vector<32x128xf32>
    %40 = math.exp %39 : vector<32x128xf32>
    %cst_12 = arith.constant 1.000000e+00 : f32
    %41 = vector.broadcast %cst_12 : f32 to vector<32x128xf32>
    %42 = arith.addf %41, %40 : vector<32x128xf32>
    %43 = arith.divf %41, %42 : vector<32x128xf32>
    %44 = arith.mulf %38, %43 : vector<32x128xf32>
    %45 = arith.truncf %37 : vector<32x128xf32> to vector<32x128xbf16>
    %46 = arith.truncf %44 : vector<32x128xf32> to vector<32x128xbf16>
    %47 = tpu.concatenate %45, %46 in 1 : vector<32x128xbf16>, vector<32x128xbf16> -> vector<32x256xbf16>
    %c0_13 = arith.constant 0 : index
    %c0_14 = arith.constant 0 : index
    %48 = vector.load %arg4[%c0_13, %c0_14] : memref<256x128xbf16, #tpu.memory_space<vmem>>, vector<256x128xbf16>
    %cst_15 = arith.constant dense<0.000000e+00> : vector<32x128xf32>
    %49 = tpu.matmul %47, %48, %cst_15 {dimension_numbers = #tpu.dot_dimension_numbers<[1], [0], [0], [1], [0, 0, 1, 1], [], []>} : vector<32x256xbf16>, vector<256x128xbf16>, vector<32x128xf32> -> vector<32x128xf32>
    %c0_16 = arith.constant 0 : index
    %c0_17 = arith.constant 0 : index
    %50 = vector.load %arg5[%c0_16, %c0_17] : memref<5x128xf32, #tpu.memory_space<vmem>>, vector<1x128xf32>
    %51 = vector.broadcast %50 : vector<1x128xf32> to vector<32x128xf32>
    %52 = arith.addf %49, %51 : vector<32x128xf32>
    %c1_18 = arith.constant 1 : index
    %c0_19 = arith.constant 0 : index
    %53 = vector.load %arg5[%c1_18, %c0_19] : memref<5x128xf32, #tpu.memory_space<vmem>>, vector<1x128xf32>
    %c2 = arith.constant 2 : index
    %c0_20 = arith.constant 0 : index
    %54 = vector.load %arg5[%c2, %c0_20] : memref<5x128xf32, #tpu.memory_space<vmem>>, vector<1x128xf32>
    %cst_21 = arith.constant dense<0.000000e+00> : vector<32xf32>
    %55 = vector.multi_reduction <add>, %52, %cst_21 [1] : vector<32x128xf32> to vector<32xf32>
    %56 = vector.shape_cast %55 : vector<32xf32> to vector<32x1xf32>
    %cst_22 = arith.constant 0.020833334 : f32
    %57 = vector.broadcast %cst_22 : f32 to vector<32x1xf32>
    %58 = arith.mulf %56, %57 : vector<32x1xf32>
    %59 = tpu.iota {dimensions = array<i32: 1>} : vector<1x128xi32>
    %c48_i32 = arith.constant 48 : i32
    %60 = vector.broadcast %c48_i32 : i32 to vector<1x128xi32>
    %61 = arith.cmpi slt, %59, %60 : vector<1x128xi32>
    %62 = vector.broadcast %58 : vector<32x1xf32> to vector<32x128xf32>
    %63 = arith.subf %52, %62 : vector<32x128xf32>
    %cst_23 = arith.constant 0.000000e+00 : f32
    %64 = vector.shape_cast %61 : vector<1x128xi1> to vector<1x128xi1>
    %65 = vector.broadcast %64 : vector<1x128xi1> to vector<32x128xi1>
    %66 = vector.broadcast %cst_23 : f32 to vector<32x128xf32>
    %67 = arith.select %65, %63, %66 : vector<32x128xi1>, vector<32x128xf32>
    %68 = arith.mulf %67, %67 : vector<32x128xf32>
    %cst_24 = arith.constant dense<0.000000e+00> : vector<32xf32>
    %69 = vector.multi_reduction <add>, %68, %cst_24 [1] : vector<32x128xf32> to vector<32xf32>
    %70 = vector.shape_cast %69 : vector<32xf32> to vector<32x1xf32>
    %cst_25 = arith.constant 0.020833334 : f32
    %71 = vector.broadcast %cst_25 : f32 to vector<32x1xf32>
    %72 = arith.mulf %70, %71 : vector<32x1xf32>
    %73 = vector.broadcast %58 : vector<32x1xf32> to vector<32x128xf32>
    %74 = arith.subf %52, %73 : vector<32x128xf32>
    %cst_26 = arith.constant 9.99999974E-6 : f32
    %75 = vector.broadcast %cst_26 : f32 to vector<32x1xf32>
    %76 = arith.addf %72, %75 : vector<32x1xf32>
    %77 = math.rsqrt %76 : vector<32x1xf32>
    %78 = vector.broadcast %77 : vector<32x1xf32> to vector<32x128xf32>
    %79 = arith.mulf %74, %78 : vector<32x128xf32>
    %80 = vector.broadcast %53 : vector<1x128xf32> to vector<32x128xf32>
    %81 = arith.mulf %79, %80 : vector<32x128xf32>
    %82 = vector.broadcast %54 : vector<1x128xf32> to vector<32x128xf32>
    %83 = arith.addf %81, %82 : vector<32x128xf32>
    %84 = arith.negf %83 : vector<32x128xf32>
    %85 = math.exp %84 : vector<32x128xf32>
    %cst_27 = arith.constant 1.000000e+00 : f32
    %86 = vector.broadcast %cst_27 : f32 to vector<32x128xf32>
    %87 = arith.addf %86, %85 : vector<32x128xf32>
    %88 = arith.divf %86, %87 : vector<32x128xf32>
    %89 = arith.mulf %83, %88 : vector<32x128xf32>
    %90 = arith.truncf %89 : vector<32x128xf32> to vector<32x128xbf16>
    %c0_28 = arith.constant 0 : index
    %c0_29 = arith.constant 0 : index
    %91 = vector.load %arg6[%c0_28, %c0_29] : memref<128x128xbf16, #tpu.memory_space<vmem>>, vector<128x128xbf16>
    %cst_30 = arith.constant dense<0.000000e+00> : vector<32x128xf32>
    %92 = tpu.matmul %90, %91, %cst_30 {dimension_numbers = #tpu.dot_dimension_numbers<[1], [0], [0], [1], [0, 0, 1, 1], [], []>} : vector<32x128xbf16>, vector<128x128xbf16>, vector<32x128xf32> -> vector<32x128xf32>
    %c3 = arith.constant 3 : index
    %c0_31 = arith.constant 0 : index
    %93 = vector.load %arg5[%c3, %c0_31] : memref<5x128xf32, #tpu.memory_space<vmem>>, vector<1x128xf32>
    %94 = vector.broadcast %93 : vector<1x128xf32> to vector<32x128xf32>
    %95 = arith.addf %92, %94 : vector<32x128xf32>
    %96 = arith.truncf %0 : vector<32x128xf32> to vector<32x128xbf16>
    %c0_32 = arith.constant 0 : index
    %c0_33 = arith.constant 0 : index
    %97 = vector.load %arg7[%c0_32, %c0_33] : memref<128x128xbf16, #tpu.memory_space<vmem>>, vector<128x128xbf16>
    %cst_34 = arith.constant dense<0.000000e+00> : vector<32x128xf32>
    %98 = tpu.matmul %96, %97, %cst_34 {dimension_numbers = #tpu.dot_dimension_numbers<[1], [0], [0], [1], [0, 0, 1, 1], [], []>} : vector<32x128xbf16>, vector<128x128xbf16>, vector<32x128xf32> -> vector<32x128xf32>
    %c4 = arith.constant 4 : index
    %c0_35 = arith.constant 0 : index
    %99 = vector.load %arg5[%c4, %c0_35] : memref<5x128xf32, #tpu.memory_space<vmem>>, vector<1x128xf32>
    %100 = vector.broadcast %99 : vector<1x128xf32> to vector<32x128xf32>
    %101 = arith.addf %98, %100 : vector<32x128xf32>
    %102 = arith.addf %101, %95 : vector<32x128xf32>
    %c0_36 = arith.constant 0 : index
    %c0_37 = arith.constant 0 : index
    %103 = vector.load %arg8[%c0_36, %c0_37] : memref<32x128xf32, #tpu.memory_space<vmem>>, vector<32x128xf32>
    tpu.vector_store %arg8[%c0_36, %c0_37], %102 {strides = array<i32>} : memref<32x128xf32, #tpu.memory_space<vmem>>, vector<32x128xf32>,
    return
  }
  func.func @transform_0(%arg0: i32) -> (i32, i32) {
    %c0_i32 = arith.constant 0 : i32
    %c0_i32_0 = arith.constant 0 : i32
    return %arg0, %c0_i32 : i32, i32
  }
  func.func @transform_1(%arg0: i32) -> (i32, i32) {
    %c0_i32 = arith.constant 0 : i32
    %c0_i32_0 = arith.constant 0 : i32
    return %arg0, %c0_i32 : i32, i32
  }
  func.func @transform_2(%arg0: i32) -> (i32, i32) {
    %c0_i32 = arith.constant 0 : i32
    %c0_i32_0 = arith.constant 0 : i32
    %c0_i32_1 = arith.constant 0 : i32
    return %c0_i32, %c0_i32_0 : i32, i32
  }
  func.func @transform_3(%arg0: i32) -> (i32, i32) {
    %c0_i32 = arith.constant 0 : i32
    %c0_i32_0 = arith.constant 0 : i32
    %c0_i32_1 = arith.constant 0 : i32
    return %c0_i32, %c0_i32_0 : i32, i32
  }
  func.func @transform_4(%arg0: i32) -> (i32, i32) {
    %c0_i32 = arith.constant 0 : i32
    %c0_i32_0 = arith.constant 0 : i32
    %c0_i32_1 = arith.constant 0 : i32
    return %c0_i32, %c0_i32_0 : i32, i32
  }
  func.func @transform_5(%arg0: i32) -> (i32, i32) {
    %c0_i32 = arith.constant 0 : i32
    %c0_i32_0 = arith.constant 0 : i32
    %c0_i32_1 = arith.constant 0 : i32
    return %c0_i32, %c0_i32_0 : i32, i32
  }
  func.func @transform_6(%arg0: i32) -> (i32, i32) {
    %c0_i32 = arith.constant 0 : i32
    %c0_i32_0 = arith.constant 0 : i32
    %c0_i32_1 = arith.constant 0 : i32
    return %c0_i32, %c0_i32_0 : i32, i32
  }
  func.func @transform_7(%arg0: i32) -> (i32, i32) {
    %c0_i32 = arith.constant 0 : i32
    %c0_i32_0 = arith.constant 0 : i32
    return %arg0, %c0_i32 : i32, i32
  }
}

</mosaic_0001>

<bundles_post_ra>
// kernel: tpu_custom_call.1
= control target key start
LH: loop header
LB: loop body
LE: loop exit
PB: predicated region body
PF: predicated region fallthrough
CT: control target
= control target key end

     0   :  { %12 = vsyncpa [#allocation3], 0  ;;  %s1407_s0 = inlined_call_operand.hbm [shape: f32[32,128], index: 0, kind: input, shape index: {}]   ;;  %s1408_s1 = inlined_call_operand.hbm [shape: f32[32,128], index: 1, kind: input, shape index: {}]   ;;  %s1409_s2 = inlined_call_operand.vmem [shape: f32[2,128], index: 2, kind: input, shape index: {}]   ;;  %s1410_s3 = inlined_call_operand.hbm [shape: bf16[256,128], index: 3, kind: input, shape index: {}]   ;;  %s1411_s4 = inlined_call_operand.vmem [shape: f32[5,128], index: 4, kind: input, shape index: {}]   ;;  %s1412_s5 = inlined_call_operand.hbm [shape: bf16[128,128], index: 5, kind: input, shape index: {}]   ;;  %s1413_s6 = inlined_call_operand.hbm [shape: bf16[128,128], index: 6, kind: input, shape index: {}]   ;;  %s1414_s7 = inlined_call_operand.hbm [shape: f32[32,128], index: 7, kind: output, shape index: {}]  }
   0x1   :  { %13 = vsyncpa [#allocation6], 0 }
   0x2   :  { %14 = vsyncpa [#allocation9], 0 }
   0x3   :  { %15 = vsyncpa [#allocation4], 0  ;;  %s1178_s24 = smov [#allocation5]   ;;  %s1038_s28 = scalar_lea.hbm %s1408_s1, 512 }
   0x4   :  { %s33_s25 = sshll.u32 %s1178_s24, 4  ;;  %p1039_p0 = scmp.ne.s32.totalorder %s1408_s1, %s1038_s28  ;;  %s34_s25 = int_to_ptr.vmem [resolvable:$true] %s33_s25 }
   0x5   :  { %p1042_p1 = scmp.lt.u32.totalorder %s1038_s28, %s1408_s1 }
   0x7   :  { %p1044_p2 = pnand %p1042_p1, %p1039_p0 }
   0x9   :  { %1047 = shalt.err (!%p1044_p2)
}
   0xa   :  { %s1048_s10 = scalar_lea.vmem %s34_s25, 512  ;;  %p1053_p4 = scmp.lt.s32.totalorder %s34_s25, %s34_s25 }
   0xb   :  { %p1049_p3 = scmp.ne.s32.totalorder %s34_s25, %s1048_s10  ;;  %p1054_p5 = scmp.lt.s32.totalorder %s1048_s10, %s1048_s10 }
   0xd   :  { %p1055_p6 = por %p1054_p5, %p1053_p4 }
   0xf   :  { %p1056_p7 = pnand %p1055_p6, %p1049_p3 }
  0x11   :  { %1059 = shalt.err (!%p1056_p7)
}
  0x12   :  { %s1179_s11 = smov 128   ;;  %s1180_s12 = smov 8  }
  0x13   :  { %39 = dma.hbm_to_vmem [thread:$0]  %s1408_s1, 512, %s34_s25, [#allocation6], %s1179_s11, %s1179_s11, %s1180_s12  }
  0x14   :  { %s1181_s15 = smov [#allocation8]   ;;  %s1182_s17 = smov [#allocation2]  }
  0x15   :  { %s61_s16 = sshll.u32 %s1181_s15, 4  ;;  %s21_s18 = sshll.u32 %s1182_s17, 4  ;;  %s62_s16 = int_to_ptr.vmem [resolvable:$true] %s61_s16  ;;  %s22_s18 = int_to_ptr.vmem [resolvable:$true] %s21_s18 }
  0x16   :  { %s1060_s21 = scalar_lea.hbm %s1412_s5, 1024 }
  0x17   :  { %p1061_p8 = scmp.ne.s32.totalorder %s1412_s5, %s1060_s21  ;;  %p1064_p9 = scmp.lt.u32.totalorder %s1060_s21, %s1412_s5 }
  0x19   :  { %p1066_p10 = pnand %p1064_p9, %p1061_p8 }
  0x1b   :  { %1069 = shalt.err (!%p1066_p10)
}
  0x1c   :  { %s1070_s1 = scalar_lea.vmem %s62_s16, 1024  ;;  %p1075_p12 = scmp.lt.s32.totalorder %s62_s16, %s62_s16 }
  0x1d   :  { %p1071_p11 = scmp.ne.s32.totalorder %s62_s16, %s1070_s1  ;;  %p1076_p13 = scmp.lt.s32.totalorder %s1070_s1, %s1070_s1 }
  0x1f   :  { %p1077_p0 = por %p1076_p13, %p1075_p12 }
  0x21   :  { %p1078_p1 = pnand %p1077_p0, %p1071_p11 }
  0x23   :  { %1081 = shalt.err (!%p1078_p1)
}
  0x24   :  { %s1183_s25 = smov 64   ;;  %s1184_s27 = smov 4  }
  0x25   :  { %67 = dma.hbm_to_vmem [thread:$0]  %s1412_s5, 1024, %s62_s16, [#allocation9], %s1183_s25, %s1183_s25, %s1184_s27  }
  0x26   :  { %s1082_s9 = scalar_lea.hbm %s1407_s0, 512 }
  0x27   :  { %p1083_p2 = scmp.ne.s32.totalorder %s1407_s0, %s1082_s9  ;;  %p1086_p3 = scmp.lt.u32.totalorder %s1082_s9, %s1407_s0 }
  0x29   :  { %p1088_p4 = pnand %p1086_p3, %p1083_p2 }
  0x2b   :  { %1091 = shalt.err (!%p1088_p4)
}
  0x2c   :  { %s1092_s17 = scalar_lea.vmem %s22_s18, 512  ;;  %p1097_p6 = scmp.lt.s32.totalorder %s22_s18, %s22_s18 }
  0x2d   :  { %p1093_p5 = scmp.ne.s32.totalorder %s22_s18, %s1092_s17  ;;  %p1098_p7 = scmp.lt.s32.totalorder %s1092_s17, %s1092_s17 }
  0x2f   :  { %p1099_p8 = por %p1098_p7, %p1097_p6 }
  0x31   :  { %p1100_p9 = pnand %p1099_p8, %p1093_p5 }
  0x33   :  { %1103 = shalt.err (!%p1100_p9)
}
  0x34   :  { %27 = dma.hbm_to_vmem [thread:$0]  %s1407_s0, 512, %s22_s18, [#allocation3], %s1179_s11, %s1179_s11, %s1180_s12  }
  0x35   :  { %s1185_s19 = smov [#allocation7]   ;;  %s1186_s21 = smov [#allocation10]  }
  0x36   :  { %s47_s20 = sshll.u32 %s1185_s19, 4  ;;  %s73_s22 = sshll.u32 %s1186_s21, 4  ;;  %s48_s20 = int_to_ptr.vmem [resolvable:$true] %s47_s20  ;;  %s74_s22 = int_to_ptr.vmem [resolvable:$true] %s73_s22 }
  0x37   :  { %s1104_s26 = scalar_lea.hbm %s1410_s3, 2048 }
  0x38   :  { %p1105_p10 = scmp.ne.s32.totalorder %s1410_s3, %s1104_s26  ;;  %p1108_p11 = scmp.lt.u32.totalorder %s1104_s26, %s1410_s3 }
  0x3a   :  { %p1110_p12 = pnand %p1108_p11, %p1105_p10 }
  0x3c   :  { %1113 = shalt.err (!%p1110_p12)
}
  0x3d   :  { %s1114_s0 = scalar_lea.vmem %s48_s20, 2048  ;;  %p1119_p0 = scmp.lt.s32.totalorder %s48_s20, %s48_s20 }
  0x3e   :  { %p1115_p13 = scmp.ne.s32.totalorder %s48_s20, %s1114_s0  ;;  %p1120_p1 = scmp.lt.s32.totalorder %s1114_s0, %s1114_s0 }
  0x40   :  { %p1121_p2 = por %p1120_p1, %p1119_p0 }
  0x42   :  { %p1122_p3 = pnand %p1121_p2, %p1115_p13 }
  0x44   :  { %1125 = shalt.err (!%p1122_p3)
}
  0x45   :  { %53 = dma.hbm_to_vmem [thread:$0]  %s1410_s3, 2048, %s48_s20, [#allocation6], %s1183_s25, %s1183_s25, %s1184_s27  }
  0x46   :  { %s1126_s13 = scalar_lea.hbm %s1413_s6, 1024 }
  0x47   :  { %p1127_p4 = scmp.ne.s32.totalorder %s1413_s6, %s1126_s13  ;;  %p1130_p5 = scmp.lt.u32.totalorder %s1126_s13, %s1413_s6 }
  0x49   :  { %p1132_p6 = pnand %p1130_p5, %p1127_p4 }
  0x4b   :  { %1135 = shalt.err (!%p1132_p6)
}
  0x4c   :  { %s1136_s16 = scalar_lea.vmem %s74_s22, 1024  ;;  %p1141_p8 = scmp.lt.s32.totalorder %s74_s22, %s74_s22 }
  0x4d   :  { %p1137_p7 = scmp.ne.s32.totalorder %s74_s22, %s1136_s16  ;;  %p1142_p9 = scmp.lt.s32.totalorder %s1136_s16, %s1136_s16 }
  0x4f   :  { %p1143_p10 = por %p1142_p9, %p1141_p8 }
  0x51   :  { %p1144_p11 = pnand %p1143_p10, %p1137_p7 }
  0x53   :  { %1147 = shalt.err (!%p1144_p11)
}
  0x54   :  { %79 = dma.hbm_to_vmem [thread:$0]  %s1413_s6, 1024, %s74_s22, [#allocation9], %s1183_s25, %s1183_s25, %s1184_s27  }
  0x55   :  { %1170 = dma.done.wait [#allocation3], 512  }
  0x56   :  { %1171 = vsyncadd [#allocation3], 4294966784 }
  0x57   :  { %1172 = dma.done.wait [#allocation6], 2560  }
  0x58   :  { %1173 = vsyncadd [#allocation6], 4294964736 }
  0x59   :  { %1174 = dma.done.wait [#allocation9], 2048  }
  0x5a   :  { %1175 = vsyncadd [#allocation9], 4294965248  ;;  %v1303_v0 = vld [vmem:[#allocation2] sm:$0xff]  ;;  %v1305_v1 = vld [vmem:[#allocation2 + $0x10] sm:$0xff]  ;;  %v114_v4 = vlaneseq  ;;  %s1187_s0 = smov [#allocation11]  }
  0x5b   :  { %v1307_v2 = vld [vmem:[#allocation2 + $0x8] sm:$0xff]  ;;  %102 = vadd.xlane.f32.xlu0 %v1303_v0  ;;  %106 = vadd.xlane.f32.xlu1 %v1305_v1  ;;  %v1311_v3 = vld [vmem:[#allocation2 + $0x18] sm:$0xff]  ;;  %v942_v26 = vld [vmem:[#allocation7 + $0x40] sm:$0xff]   ;;  %s767_s18 = sshll.u32 %s1187_s0, 4  ;;  %s768_s18 = int_to_ptr.vmem [resolvable:$true] %s767_s18 }
  0x5c   :  { %v1315_v5 = vand.u32 127, %v114_v4  ;;  %v943_v27 = vld [vmem:[#allocation7] sm:$0xff]   ;;  %v944_v28 = vld [vmem:[#allocation7 + $0x48] sm:$0xff]   ;;  %832 = vmatprep.subr.bf16.mxu0 %v942_v26  ;;  %v946_v30 = vld [vmem:[#allocation7 + $0x50] sm:$0xff]   ;;  %s1148_s8 = scalar_lea.vmem %s768_s18, 512  ;;  %p1153_p13 = scmp.lt.s32.totalorder %s768_s18, %s768_s18 }
  0x5d   :  { %833 = vmatpush3.bf16.msra.mxu0 %v943_v27  ;;  %v945_v29 = vld [vmem:[#allocation7 + $0x8] sm:$0xff]   ;;  %v199_v31 = vld [vmem:[#allocation5] sm:$0xff]  ;;  %v947_v35 = vld [vmem:[#allocation7 + $0x10] sm:$0xff]   ;;  %p1149_p12 = scmp.ne.s32.totalorder %s768_s18, %s1148_s8  ;;  %p1154_p0 = scmp.lt.s32.totalorder %s1148_s8, %s1148_s8 }
  0x5e   :  { %vm116_vm0 = vcmp.lt.s32.totalorder %v1315_v5, 24  ;;  %834 = vmatprep.subr.bf16.mxu0 %v944_v28  ;;  %v200_v32 = vld [vmem:[#allocation5 + $0x8] sm:$0xff]  ;;  %v787_v33 = vmul.f32 -1.442695, %v199_v31  ;;  %v948_v36 = vld [vmem:[#allocation7 + $0x58] sm:$0xff]   ;;  %v950_v38 = vld [vmem:[#allocation7 + $0x60] sm:$0xff]  }
  0x5f   :  { %104 = vadd.xlane.f32.xlu0 %v1307_v2  ;;  %108 = vadd.xlane.f32.xlu1 %v1311_v3  ;;  %v788_v34 = vmul.f32 -1.442695, %v200_v32  ;;  %v949_v37 = vld [vmem:[#allocation7 + $0x18] sm:$0xff]   ;;  %v951_v39 = vld [vmem:[#allocation7 + $0x20] sm:$0xff]   ;;  %v952_v40 = vld [vmem:[#allocation7 + $0x68] sm:$0xff]   ;;  %vm431_vm1 = vcmp.lt.s32.totalorder %v1315_v5, 48  ;;  %p1155_p1 = por %p1154_p0, %p1153_p13 }
  0x60   :  { %974 = vpow2.f32 %v787_v33  ;;  %v953_v43 = vld [vmem:[#allocation7 + $0x28] sm:$0xff]   ;;  %v954_v45 = vld [vmem:[#allocation7 + $0x70] sm:$0xff]   ;;  %v956_v48 = vld [vmem:[#allocation7 + $0x78] sm:$0xff]  }
  0x61   :  { %835 = vmatpush3.bf16.msra.mxu0 %v945_v29  ;;  %976 = vpow2.f32 %v788_v34  ;;  %v955_v47 = vld [vmem:[#allocation7 + $0x30] sm:$0xff]   ;;  %v957_v49 = vld [vmem:[#allocation7 + $0x38] sm:$0xff]   ;;  %p1156_p2 = pnand %p1155_p1, %p1149_p12 }
  0x62   :  { %836 = vmatprep.subr.bf16.mxu0 %v946_v30  ;;  %v964_v5 = vld [vmem:[#allocation8 + $0x30] sm:$0xff]  }
  0x65   :  { %837 = vmatpush3.bf16.msra.mxu0 %v947_v35 }
  0x66   :  { %838 = vmatprep.subr.bf16.mxu0 %v948_v36 }
  0x69   :  { %839 = vmatpush3.bf16.msra.mxu0 %v949_v37 }
  0x6a   :  { %840 = vmatprep.subr.bf16.mxu0 %v950_v38  ;;  %v975_v41 = vpop.eup %974 }
  0x6b   :  { %v977_v42 = vpop.eup %976  ;;  %v215_v44 = vadd.f32 1.0, %v975_v41 }
  0x6c   :  { %v216_v46 = vadd.f32 1.0, %v977_v42 }
  0x6d   :  { %841 = vmatpush3.bf16.msra.mxu0 %v951_v39  ;;  %978 = vrcp.f32 %v215_v44 }
  0x6e   :  { %842 = vmatprep.subr.bf16.mxu0 %v952_v40  ;;  %980 = vrcp.f32 %v216_v46 }
  0x71   :  { %843 = vmatpush3.bf16.msra.mxu0 %v953_v43 }
  0x72   :  { %844 = vmatprep.subr.bf16.mxu0 %v954_v45 }
  0x75   :  { %845 = vmatpush3.bf16.msra.mxu0 %v955_v47 }
  0x76   :  { %846 = vmatprep.subr.bf16.mxu0 %v956_v48 }
  0x77   :  { %v979_v50 = vpop.eup %978 }
  0x78   :  { %v981_v51 = vpop.eup %980  ;;  %v227_v52 = vmul.f32 %v979_v50, %v199_v31 }
  0x79   :  { %847 = vmatpush3.bf16.msra.mxu0 %v957_v49  ;;  %v228_v53 = vmul.f32 %v981_v51, %v200_v32 }
  0x7b   :  { %v233_v54 = vpack.c.bf16 %v228_v53, %v227_v52 }
  0x7d   :  { %400 = vmatprep.mubr.bf16.mxu0 %v233_v54 }
  0xe8   :  { %v103_v6 = vpop.xlane.xlu0 %102  ;;  %v107_v7 = vpop.xlane.xlu1 %106 }
  0xe9   :  { %v110_v8 = vmul.f32 0.041666668, %v103_v6  ;;  %v112_v9 = vmul.f32 0.041666668, %v107_v7 }
  0xeb   :  { %v1319_v10 = vsub.f32 %v1303_v0, %v110_v8  ;;  %v1322_v11 = vsub.f32 %v1305_v1, %v112_v9  ;;  %v201_v8 = vld [vmem:[#allocation5 + $0x10] sm:$0xff]  ;;  %v202_v9 = vld [vmem:[#allocation5 + $0x18] sm:$0xff] }
  0xec   :  { %v105_v12 = vpop.xlane.xlu0 %104  ;;  %v109_v13 = vpop.xlane.xlu1 %108 }
  0xed   :  { %v111_v14 = vmul.f32 0.041666668, %v105_v12  ;;  %v113_v15 = vmul.f32 0.041666668, %v109_v13  ;;  %v123_v16 = vsel %vm116_vm0, %v1319_v10, 0.0  ;;  %v125_v17 = vsel %vm116_vm0, %v1322_v11, 0.0 }
  0xee   :  { %v127_v18 = vmul.f32 %v123_v16, %v123_v16  ;;  %v129_v21 = vmul.f32 %v125_v17, %v125_v17  ;;  %v789_v12 = vmul.f32 -1.442695, %v201_v8  ;;  %v782_v17 = vld [vmem:[%s1409_s2 + $0x1] ss:$0 sm:$0xff] }
  0xef   :  { %v1327_v19 = vsub.f32 %v1307_v2, %v111_v14  ;;  %v1330_v20 = vsub.f32 %v1311_v3, %v113_v15  ;;  %v781_v14 = vld [vmem:[%s1409_s2] ss:$0 sm:$0xff]  ;;  %v790_v15 = vmul.f32 -1.442695, %v202_v9 }
  0xf0   :  { %131 = vadd.xlane.f32.xlu0 %v127_v18 }
  0xf1   :  { %v124_v22 = vsel %vm116_vm0, %v1327_v19, 0.0  ;;  %v126_v23 = vsel %vm116_vm0, %v1330_v20, 0.0 }
  0xf2   :  { %v128_v24 = vmul.f32 %v124_v22, %v124_v22  ;;  %v130_v25 = vmul.f32 %v126_v23, %v126_v23 }
  0xf4   :  { %135 = vadd.xlane.f32.xlu0 %v129_v21  ;;  %133 = vadd.xlane.f32.xlu1 %v128_v24 }
  0xf8   :  { %137 = vadd.xlane.f32.xlu1 %v130_v25 }
 0x17d   :  { %v132_v55 = vpop.xlane.xlu0 %131 }
 0x17e   :  { %v139_v56 = vmul.f32 0.041666668, %v132_v55 }
 0x180   :  { %v143_v57 = vadd.f32 1e-05, %v139_v56 }
 0x181   :  { %v134_v58 = vpop.xlane.xlu1 %133  ;;  %v136_v59 = vpop.xlane.xlu0 %135 }
 0x182   :  { %982 = vrsqrt.f32 %v143_v57  ;;  %v140_v60 = vmul.f32 0.041666668, %v134_v58  ;;  %v141_v61 = vmul.f32 0.041666668, %v136_v59 }
 0x184   :  { %v144_v62 = vadd.f32 1e-05, %v140_v60  ;;  %v145_v63 = vadd.f32 1e-05, %v141_v61 }
 0x185   :  { %v138_v4 = vpop.xlane.xlu1 %137 }
 0x186   :  { %984 = vrsqrt.f32 %v144_v62  ;;  %v142_v6 = vmul.f32 0.041666668, %v138_v4 }
 0x187   :  { %986 = vrsqrt.f32 %v145_v63  ;;  %v791_v63 = vld [vmem:[%s1411_s4] ss:$0 sm:$0xff] }
 0x188   :  { %v146_v7 = vadd.f32 1e-05, %v142_v6 }
 0x18a   :  { %988 = vrsqrt.f32 %v146_v7 }
 0x18b   :  { %990 = vpow2.f32 %v789_v12 }
 0x18c   :  { %v983_v13 = vpop.eup %982  ;;  %992 = vpow2.f32 %v790_v15 }
 0x18d   :  { %v151_v16 = vmul.f32 %v983_v13, %v1319_v10 }
 0x18f   :  { %v159_v18 = vmul.f32 %v781_v14, %v151_v16 }
 0x190   :  { %v985_v21 = vpop.eup %984 }
 0x191   :  { %v987_v22 = vpop.eup %986  ;;  %v152_v23 = vmul.f32 %v985_v21, %v1327_v19  ;;  %v167_v24 = vadd.f32 %v782_v17, %v159_v18 }
 0x192   :  { %v153_v25 = vmul.f32 %v987_v22, %v1322_v11 }
 0x193   :  { %v160_v26 = vmul.f32 %v781_v14, %v152_v23  ;;  %v783_v27 = vmul.f32 -1.442695, %v167_v24 }
 0x194   :  { %v989_v28 = vpop.eup %988  ;;  %v161_v29 = vmul.f32 %v781_v14, %v153_v25 }
 0x195   :  { %v168_v30 = vadd.f32 %v782_v17, %v160_v26  ;;  %994 = vpow2.f32 %v783_v27  ;;  %v154_v10 = vmul.f32 %v989_v28, %v1330_v20  ;;  %v991_v35 = vpop.eup %990 }
 0x196   :  { %v169_v31 = vadd.f32 %v782_v17, %v161_v29  ;;  %v993_v37 = vpop.eup %992  ;;  %v217_v38 = vadd.f32 1.0, %v991_v35 }
 0x197   :  { %v784_v32 = vmul.f32 -1.442695, %v168_v30  ;;  %v162_v33 = vmul.f32 %v781_v14, %v154_v10  ;;  %v218_v11 = vadd.f32 1.0, %v993_v37 }
 0x198   :  { %v785_v34 = vmul.f32 -1.442695, %v169_v31 }
 0x199   :  { %996 = vpow2.f32 %v784_v32  ;;  %v170_v36 = vadd.f32 %v782_v17, %v162_v33 }
 0x19a   :  { %998 = vpow2.f32 %v785_v34 }
 0x19b   :  { %v786_v19 = vmul.f32 -1.442695, %v170_v36 }
 0x19d   :  { %1000 = vpow2.f32 %v786_v19 }
 0x19e   :  { %1002 = vrcp.f32 %v217_v38 }
 0x19f   :  { %v995_v39 = vpop.eup %994  ;;  %1004 = vrcp.f32 %v218_v11 }
 0x1a0   :  { %v183_v40 = vadd.f32 1.0, %v995_v39 }
 0x1a2   :  { %1006 = vrcp.f32 %v183_v40  ;;  %v958_v40 = vld [vmem:[#allocation8] sm:$0xff]  }
 0x1a3   :  { %v997_v41 = vpop.eup %996  ;;  %880 = vmatprep.subr.bf16.mxu1 %v958_v40 }
 0x1a4   :  { %v184_v42 = vadd.f32 1.0, %v997_v41  ;;  %v999_v20 = vpop.eup %998  ;;  %v959_v41 = vld [vmem:[#allocation8 + $0x8] sm:$0xff]   ;;  %881 = vmatpush3.bf16.msra.mxu1 %v958_v40  ;;  %v634_v40 = vpack.c.bf16 %v1307_v2, %v1303_v0  ;;  %v972_v0 = vld [vmem:[#allocation10 + $0x30] sm:$0xff]   ;;  %v973_v2 = vld [vmem:[#allocation10 + $0x38] sm:$0xff]  }
 0x1a5   :  { %v185_v44 = vadd.f32 1.0, %v999_v20  ;;  %882 = vmatprep.subr.bf16.mxu1 %v959_v41  ;;  %v961_v20 = vld [vmem:[#allocation8 + $0x18] sm:$0xff]  }
 0x1a6   :  { %1008 = vrcp.f32 %v184_v42  ;;  %v960_v42 = vld [vmem:[#allocation8 + $0x10] sm:$0xff]  }
 0x1a7   :  { %v1001_v43 = vpop.eup %1000 }
 0x1a8   :  { %v186_v45 = vadd.f32 1.0, %v1001_v43  ;;  %v1003_v46 = vpop.eup %1002  ;;  %883 = vmatpush3.bf16.msra.mxu1 %v959_v41  ;;  %v962_v43 = vld [vmem:[#allocation8 + $0x20] sm:$0xff]  }
 0x1a9   :  { %v1005_v47 = vpop.eup %1004  ;;  %v229_v49 = vmul.f32 %v1003_v46, %v201_v8  ;;  %884 = vmatprep.subr.bf16.mxu1 %v960_v42  ;;  %v1368_v46 = vld [vmem:[#allocation10] sm:$0xff]  }
 0x1aa   :  { %1010 = vrcp.f32 %v186_v45  ;;  %v230_v50 = vmul.f32 %v1005_v47, %v202_v9  ;;  %v965_v45 = vld [vmem:[#allocation8 + $0x38] sm:$0xff]  }
 0x1ab   :  { %1012 = vrcp.f32 %v185_v44  ;;  %v963_v44 = vld [vmem:[#allocation8 + $0x28] sm:$0xff]  }
 0x1ac   :  { %v1007_v48 = vpop.eup %1006  ;;  %v234_v54 = vpack.c.bf16 %v230_v50, %v229_v49  ;;  %885 = vmatpush3.bf16.msra.mxu1 %v960_v42  ;;  %v967_v42 = vld [vmem:[#allocation10 + $0x8] sm:$0xff]  }
 0x1ad   :  { %v195_v52 = vmul.f32 %v1007_v48, %v167_v24  ;;  %886 = vmatprep.subr.bf16.mxu1 %v961_v20 }
 0x1b0   :  { %v1009_v51 = vpop.eup %1008  ;;  %887 = vmatpush3.bf16.msra.mxu1 %v961_v20  ;;  %v968_v20 = vld [vmem:[#allocation10 + $0x10] sm:$0xff]  }
 0x1b1   :  { %v196_v53 = vmul.f32 %v1009_v51, %v168_v30  ;;  %888 = vmatprep.subr.bf16.mxu1 %v962_v43 }
 0x1b3   :  { %v231_v55 = vpack.c.bf16 %v196_v53, %v195_v52 }
 0x1b4   :  { %v1011_v56 = vpop.eup %1010  ;;  %889 = vmatpush3.bf16.msra.mxu1 %v962_v43  ;;  %v969_v43 = vld [vmem:[#allocation10 + $0x18] sm:$0xff]  }
 0x1b5   :  { %401 = vmatmul.mubr.bf16.vlgmr.msra.gmra.mrb[0].mxu0 %v231_v55  ;;  %v1013_v57 = vpop.eup %1012  ;;  %v198_v58 = vmul.f32 %v1011_v56, %v170_v36  ;;  %890 = vmatprep.subr.bf16.mxu1 %v963_v44 }
 0x1b6   :  { %408 = vmatprep.mubr.bf16.mxu0 %v234_v54  ;;  %v197_v59 = vmul.f32 %v1013_v57, %v169_v31 }
 0x1b8   :  { %v232_v60 = vpack.c.bf16 %v198_v58, %v197_v59  ;;  %891 = vmatpush3.bf16.msra.mxu1 %v963_v44  ;;  %v970_v44 = vld [vmem:[#allocation10 + $0x20] sm:$0xff]  }
 0x1b9   :  { %892 = vmatprep.subr.bf16.mxu1 %v964_v5 }
 0x1bc   :  { %893 = vmatpush3.bf16.msra.mxu1 %v964_v5  ;;  %v971_v5 = vld [vmem:[#allocation10 + $0x28] sm:$0xff]  }
 0x1bd   :  { %409 = vmatmul.mubr.bf16.gmra.mrb[4].mxu0 %v232_v60  ;;  %894 = vmatprep.subr.bf16.mxu1 %v965_v45  ;;  %v808_v60 = vld [vmem:[%s1411_s4 + $0x1] ss:$0 sm:$0xff] }
 0x1c0   :  { %895 = vmatpush3.bf16.msra.mxu1 %v965_v45  ;;  %v635_v45 = vpack.c.bf16 %v1311_v3, %v1305_v1 }
 0x1c1   :  { %900 = vmatprep.subr.bf16.mxu1 %v1368_v46 }
 0x288   :  { %v848_v61 = vpop.f32.mrb[0].mxu0 }
 0x289   :  { %v849_v62 = vpop.f32.mrb[1].mxu0 }
 0x28a   :  { %v850_v4 = vadd.f32 %v849_v62, %v848_v61  ;;  %v851_v6 = vpop.f32.mrb[2].mxu0 }
 0x28b   :  { %v852_v7 = vpop.f32.mrb[3].mxu0 }
 0x28c   :  { %v853_v8 = vadd.f32 %v852_v7, %v851_v6  ;;  %v403_v9 = vadd.f32 %v850_v4, %v791_v63 }
 0x28e   :  { %419 = vadd.xlane.f32.xlu0 %v403_v9  ;;  %v406_v12 = vadd.f32 %v853_v8, %v791_v63 }
 0x290   :  { %421 = vadd.xlane.f32.xlu1 %v406_v12  ;;  %v854_v13 = vpop.f32.mrb[4].mxu0 }
 0x291   :  { %v855_v14 = vpop.f32.mrb[5].mxu0 }
 0x292   :  { %v856_v15 = vadd.f32 %v855_v14, %v854_v13  ;;  %v857_v16 = vpop.f32.mrb[6].mxu0 }
 0x293   :  { %v858_v17 = vpop.f32.mrb[7].mxu0 }
 0x294   :  { %v859_v18 = vadd.f32 %v858_v17, %v857_v16  ;;  %v411_v21 = vadd.f32 %v856_v15, %v791_v63 }
 0x296   :  { %423 = vadd.xlane.f32.xlu0 %v411_v21  ;;  %v414_v22 = vadd.f32 %v859_v18, %v791_v63  ;;  %v809_v63 = vld [vmem:[%s1411_s4 + $0x2] ss:$0 sm:$0xff] }
 0x298   :  { %425 = vadd.xlane.f32.xlu1 %v414_v22 }
 0x31b   :  { %v420_v23 = vpop.xlane.xlu0 %419 }
 0x31c   :  { %v427_v24 = vmul.f32 0.020833334, %v420_v23 }
 0x31d   :  { %v422_v25 = vpop.xlane.xlu1 %421 }
 0x31e   :  { %v1348_v26 = vsub.f32 %v403_v9, %v427_v24  ;;  %v428_v27 = vmul.f32 0.020833334, %v422_v25 }
 0x320   :  { %v1350_v28 = vsub.f32 %v406_v12, %v428_v27  ;;  %v438_v29 = vsel %vm431_vm1, %v1348_v26, 0.0 }
 0x321   :  { %v442_v30 = vmul.f32 %v438_v29, %v438_v29 }
 0x322   :  { %v439_v10 = vsel %vm431_vm1, %v1350_v28, 0.0 }
 0x323   :  { %446 = vadd.xlane.f32.xlu0 %v442_v30  ;;  %v424_v31 = vpop.xlane.xlu0 %423  ;;  %v443_v32 = vmul.f32 %v439_v10, %v439_v10 }
 0x324   :  { %v429_v33 = vmul.f32 0.020833334, %v424_v31 }
 0x325   :  { %448 = vadd.xlane.f32.xlu1 %v443_v32  ;;  %v426_v34 = vpop.xlane.xlu1 %425 }
 0x326   :  { %v1358_v35 = vsub.f32 %v411_v21, %v429_v33  ;;  %v430_v36 = vmul.f32 0.020833334, %v426_v34 }
 0x328   :  { %v1360_v37 = vsub.f32 %v414_v22, %v430_v36  ;;  %v440_v19 = vsel %vm431_vm1, %v1358_v35, 0.0 }
 0x329   :  { %v444_v38 = vmul.f32 %v440_v19, %v440_v19 }
 0x32a   :  { %v441_v11 = vsel %vm431_vm1, %v1360_v37, 0.0 }
 0x32b   :  { %450 = vadd.xlane.f32.xlu0 %v444_v38  ;;  %v445_v39 = vmul.f32 %v441_v11, %v441_v11 }
 0x32d   :  { %452 = vadd.xlane.f32.xlu1 %v445_v39 }
 0x3b0   :  { %v447_v47 = vpop.xlane.xlu0 %446 }
 0x3b1   :  { %v454_v48 = vmul.f32 0.020833334, %v447_v47  ;;  %v823_v47 = vld [vmem:[%s1411_s4 + $0x4] ss:$0 sm:$0xff] }
 0x3b2   :  { %v449_v49 = vpop.xlane.xlu1 %448 }
 0x3b3   :  { %v458_v50 = vadd.f32 1e-05, %v454_v48  ;;  %v455_v51 = vmul.f32 0.020833334, %v449_v49 }
 0x3b5   :  { %1014 = vrsqrt.f32 %v458_v50  ;;  %v459_v52 = vadd.f32 1e-05, %v455_v51 }
 0x3b7   :  { %1016 = vrsqrt.f32 %v459_v52 }
 0x3b8   :  { %v451_v53 = vpop.xlane.xlu0 %450 }
 0x3b9   :  { %v456_v54 = vmul.f32 0.020833334, %v451_v53 }
 0x3ba   :  { %v453_v55 = vpop.xlane.xlu1 %452 }
 0x3bb   :  { %v460_v56 = vadd.f32 1e-05, %v456_v54  ;;  %v457_v57 = vmul.f32 0.020833334, %v453_v55 }
 0x3bd   :  { %1018 = vrsqrt.f32 %v460_v56  ;;  %v461_v58 = vadd.f32 1e-05, %v457_v57 }
 0x3bf   :  { %v1015_v59 = vpop.eup %1014  ;;  %1020 = vrsqrt.f32 %v461_v58 }
 0x3c0   :  { %v466_v61 = vmul.f32 %v1015_v59, %v1348_v26 }
 0x3c1   :  { %v1017_v62 = vpop.eup %1016 }
 0x3c2   :  { %v467_v4 = vmul.f32 %v1017_v62, %v1350_v28  ;;  %v474_v6 = vmul.f32 %v808_v60, %v466_v61 }
 0x3c4   :  { %v475_v7 = vmul.f32 %v808_v60, %v467_v4  ;;  %v482_v8 = vadd.f32 %v809_v63, %v474_v6 }
 0x3c6   :  { %v483_v9 = vadd.f32 %v809_v63, %v475_v7  ;;  %v810_v12 = vmul.f32 -1.442695, %v482_v8 }
 0x3c7   :  { %v1019_v13 = vpop.eup %1018 }
 0x3c8   :  { %v468_v14 = vmul.f32 %v1019_v13, %v1358_v35  ;;  %1022 = vpow2.f32 %v810_v12  ;;  %v811_v15 = vmul.f32 -1.442695, %v483_v9 }
 0x3c9   :  { %v1021_v16 = vpop.eup %1020 }
 0x3ca   :  { %v469_v17 = vmul.f32 %v1021_v16, %v1360_v37  ;;  %1024 = vpow2.f32 %v811_v15  ;;  %v476_v18 = vmul.f32 %v808_v60, %v468_v14 }
 0x3cc   :  { %v477_v21 = vmul.f32 %v808_v60, %v469_v17  ;;  %v484_v22 = vadd.f32 %v809_v63, %v476_v18 }
 0x3ce   :  { %v485_v23 = vadd.f32 %v809_v63, %v477_v21  ;;  %v812_v24 = vmul.f32 -1.442695, %v484_v22 }
 0x3d0   :  { %1026 = vpow2.f32 %v812_v24  ;;  %v813_v25 = vmul.f32 -1.442695, %v485_v23 }
 0x3d2   :  { %v1023_v26 = vpop.eup %1022  ;;  %1028 = vpow2.f32 %v813_v25 }
 0x3d3   :  { %v498_v27 = vadd.f32 1.0, %v1023_v26 }
 0x3d4   :  { %v1025_v28 = vpop.eup %1024 }
 0x3d5   :  { %v499_v29 = vadd.f32 1.0, %v1025_v28  ;;  %1030 = vrcp.f32 %v498_v27 }
 0x3d7   :  { %1032 = vrcp.f32 %v499_v29 }
 0x3da   :  { %v1027_v30 = vpop.eup %1026 }
 0x3db   :  { %v500_v10 = vadd.f32 1.0, %v1027_v30 }
 0x3dc   :  { %v1029_v31 = vpop.eup %1028 }
 0x3dd   :  { %v501_v32 = vadd.f32 1.0, %v1029_v31  ;;  %1034 = vrcp.f32 %v500_v10 }
 0x3df   :  { %v1031_v33 = vpop.eup %1030  ;;  %1036 = vrcp.f32 %v501_v32 }
 0x3e0   :  { %v510_v35 = vmul.f32 %v1031_v33, %v482_v8 }
 0x3e1   :  { %v1033_v34 = vpop.eup %1032 }
 0x3e2   :  { %v511_v36 = vmul.f32 %v1033_v34, %v483_v9 }
 0x3e4   :  { %v514_v37 = vpack.c.bf16 %v511_v36, %v510_v35 }
 0x3e6   :  { %896 = vmatprep.mubr.bf16.mxu1 %v514_v37 }
 0x3e7   :  { %v1035_v19 = vpop.eup %1034 }
 0x3e8   :  { %v512_v11 = vmul.f32 %v1035_v19, %v484_v22 }
 0x3e9   :  { %v1037_v38 = vpop.eup %1036 }
 0x3ea   :  { %v513_v39 = vmul.f32 %v1037_v38, %v485_v23 }
 0x3ec   :  { %v515_v41 = vpack.c.bf16 %v513_v39, %v512_v11 }
 0x3ee   :  { %897 = vmatmul.mubr.bf16.vlgmr.msra.gmra.mrb[0].mxu1 %v515_v41 }
 0x3ef   :  { %901 = vmatpush3.bf16.msra.mxu1 %v1368_v46  ;;  %916 = vmatprep.mubr.bf16.mxu1 %v634_v40  ;;  %v814_v46 = vld [vmem:[%s1411_s4 + $0x3] ss:$0 sm:$0xff] }
 0x3f0   :  { %902 = vmatprep.subr.bf16.mxu1 %v967_v42  ;;  %v926_v48 = vadd.f32 %v823_v47, %v814_v46 }
 0x3f3   :  { %903 = vmatpush3.bf16.msra.mxu1 %v967_v42 }
 0x3f4   :  { %904 = vmatprep.subr.bf16.mxu1 %v968_v20 }
 0x3f7   :  { %905 = vmatpush3.bf16.msra.mxu1 %v968_v20 }
 0x3f8   :  { %906 = vmatprep.subr.bf16.mxu1 %v969_v43 }
 0x3fb   :  { %907 = vmatpush3.bf16.msra.mxu1 %v969_v43 }
 0x3fc   :  { %908 = vmatprep.subr.bf16.mxu1 %v970_v44 }
 0x3ff   :  { %909 = vmatpush3.bf16.msra.mxu1 %v970_v44 }
 0x400   :  { %910 = vmatprep.subr.bf16.mxu1 %v971_v5 }
 0x403   :  { %911 = vmatpush3.bf16.msra.mxu1 %v971_v5 }
 0x404   :  { %912 = vmatprep.subr.bf16.mxu1 %v972_v0 }
 0x407   :  { %913 = vmatpush3.bf16.msra.mxu1 %v972_v0 }
 0x408   :  { %914 = vmatprep.subr.bf16.mxu1 %v973_v2 }
 0x40b   :  { %915 = vmatpush3.bf16.msra.mxu1 %v973_v2 }
 0x40e   :  { %917 = vmatmul.mubr.bf16.vlgmr.msra.gmra.mrb[0].mxu1 %v635_v45 }
 0x4e1   :  { %v918_v49 = vpop.f32.mrb[0].mxu1 }
 0x4e2   :  { %v920_v50 = vadd.f32 %v918_v49, %v814_v46  ;;  %v739_v51 = vpop.f32.mrb[1].mxu1 }
 0x4e3   :  { %v922_v52 = vadd.f32 %v814_v46, %v739_v51  ;;  %v919_v53 = vpop.f32.mrb[2].mxu1 }
 0x4e4   :  { %v921_v54 = vadd.f32 %v920_v50, %v823_v47  ;;  %v925_v1 = vadd.f32 %v926_v48, %v919_v53  ;;  %v742_v3 = vpop.f32.mrb[3].mxu1 }
 0x4e5   :  { %v923_v55 = vadd.f32 %v922_v52, %v823_v47  ;;  %v927_v56 = vadd.f32 %v926_v48, %v742_v3 }
 0x4e6   :  { %760 = vst [vmem:[#allocation11 + $0x10] sm:$0xff] %v921_v54  ;;  %761 = vst [vmem:[#allocation11 + $0x18] sm:$0xff] %v925_v1 }
 0x4e7   :  { %758 = vst [vmem:[#allocation11] sm:$0xff] %v923_v55  ;;  %759 = vst [vmem:[#allocation11 + $0x8] sm:$0xff] %v927_v56 }
 0x4e8   :  { %1159 = shalt.err (!%p1156_p2)
}
 0x4e9   :  { %s1160_s10 = scalar_lea.hbm %s1414_s7, 512 }
 0x4ea   :  { %p1161_p3 = scmp.ne.s32.totalorder %s1414_s7, %s1160_s10  ;;  %p1164_p4 = scmp.lt.u32.totalorder %s1160_s10, %s1414_s7 }
 0x4ec   :  { %p1166_p5 = pnand %p1164_p4, %p1161_p3 }
 0x4ee   :  { %1169 = shalt.err (!%p1166_p5)
}
 0x4ef   :  { %773 = dma.vmem_to_hbm [thread:$0]  %s768_s18, 512, %s1414_s7, [#allocation4], %s1179_s11, %s1179_s11, %s1180_s12  }
 0x4f0   :  { %1176 = dma.done.wait [#allocation4], 512  }
 0x4f1   :  { %1177 = vsyncadd [#allocation4], 4294966784 }
 0x4f2   :  { %777 = vsyncpa [#allocation3], 1 }
 0x4f3   :  { %778 = vsyncpa [#allocation6], 1 }
 0x4f4   :  { %779 = vsyncpa [#allocation9], 1 }
 0x4f5   :  { %780 = vsyncpa [#allocation4], 1 }

</bundles_post_ra>
